<compile_context>
chip_gen: v6e
topology: v6e:2x2x1
jax: 0.10.0
libtpu: 0.0.40
codegen_flags: <defaults>
</compile_context>

<pallas_src>
import functools

import jax
import jax.numpy as jnp
from jax.experimental import pallas as pl
from jax.experimental.pallas import tpu as pltpu


def _attn_kernel(w_ref, l_ref, g_ref, c_ref, gout_ref, *,
                 normalize_attn: bool, inv_s: float):
    # Block shapes (per grid step n over batch tiles):
    #   w_ref:    (C, 1)       conv1x1 weight (same block every step -> resident)
    #   l_ref:    (Bt, C, S)   local features
    #   g_ref:    (Bt, C, S)   global features
    #   c_ref:    (Bt, 1, S)   pre-activation attention logits (conv output)
    #   gout_ref: (Bt, 1, C)   attention-weighted pooled features
    l = l_ref[...]                                    # keep native dtype over HBM
    g = g_ref[...]
    w = w_ref[...].astype(jnp.float32)                # (C, 1)

    x = (l + g).astype(jnp.float32)                   # (Bt, C, S) f32
    # 1x1 conv, out_channels=1, no bias: c[b, s] = sum_c w[c] * x[b, c, s]
    # Broadcast-multiply (VPU) + sublane reduce over C (XLU); skips the MXU,
    # which would only use one row for this M=1 contraction.
    c = jnp.sum(x * w[jnp.newaxis, :, :], axis=1, keepdims=True)   # (Bt, 1, S) f32
    c_ref[...] = c.astype(c_ref.dtype)                # lane-dense store of logits

    if normalize_attn:
        # Online-free softmax: contract with unnormalized exp weights, then
        # normalize the tiny pooled result (exact divide on Bt*C elements).
        m = jnp.max(c, axis=-1, keepdims=True)                       # (Bt, 1, 1)
        e = jnp.exp(c - m)                                           # (Bt, 1, S)
        denom = jnp.sum(e, axis=-1, keepdims=True)                   # (Bt, 1, 1)
        pooled = jnp.einsum('bks,bcs->bkc', e.astype(l.dtype), l,
                            preferred_element_type=jnp.float32)      # (Bt, 1, C)
        gout = pooled / denom
    else:
        a = jax.nn.sigmoid(c)                                        # (Bt, 1, S)
        pooled = jnp.einsum('bks,bcs->bkc', a.astype(l.dtype), l,
                            preferred_element_type=jnp.float32)      # (Bt, 1, C)
        gout = pooled * inv_s                        # adaptive_avg_pool2d == mean

    gout_ref[...] = gout.astype(gout_ref.dtype)


def _pick_batch_tile(n: int, c: int, s: int, in_itemsize: int) -> int:
    """Largest batch tile whose double-buffered input blocks plus f32
    temporaries fit comfortably under the (raised) scoped VMEM limit, while
    keeping >= 2 grid steps when possible so both v7x TensorCores get work."""
    vmem_block_budget = 20 * 1024 * 1024  # conservative across v5e / v6e / v7x
    # 2 inputs x 2 buffers x native dtype + f32 temps (x, e/a) per batch elem,
    # plus double-buffered output blocks.
    per_batch = c * s * (2 * 2 * in_itemsize + 2 * 4) + 2 * (s + c) * 4
    bt = max(1, vmem_block_budget // per_batch)
    if n > 1:
        bt = min(bt, (n + 1) // 2)        # keep grid length >= 2 (v7x megacore)
    return int(min(bt, n))


def linear_attention_block(l, g, weight, normalize_attn: bool = True):
    """l, g: (N, C, W, H) arrays; weight: (1, C) conv1x1 weight (no bias).

    Returns (c, g_out) matching the PyTorch module:
      c:     (N, 1, W, H)  raw conv output (attention logits)
      g_out: (N, C)        attention-weighted pooled features
    """
    N, C, W, H = l.shape
    S = W * H
    l3 = l.reshape(N, C, S)
    g3 = g.reshape(N, C, S)
    w2 = weight.reshape(C, 1)   # column layout -> cheap lane broadcast in-kernel

    Bt = _pick_batch_tile(N, C, S, jnp.dtype(l.dtype).itemsize)
    num_blocks = -(-N // Bt)
    N_pad = num_blocks * Bt
    if N_pad != N:
        pad = ((0, N_pad - N), (0, 0), (0, 0))
        l3 = jnp.pad(l3, pad)
        g3 = jnp.pad(g3, pad)

    kernel = functools.partial(
        _attn_kernel, normalize_attn=normalize_attn, inv_s=1.0 / S)

    c_out, g_out = pl.pallas_call(
        kernel,
        out_shape=(
            jax.ShapeDtypeStruct((N_pad, 1, S), l.dtype),
            jax.ShapeDtypeStruct((N_pad, 1, C), l.dtype),
        ),
        grid=(num_blocks,),
        in_specs=[
            pl.BlockSpec((C, 1), lambda n: (0, 0)),         # weight (replicated)
            pl.BlockSpec((Bt, C, S), lambda n: (n, 0, 0)),  # l, Bt batches/step
            pl.BlockSpec((Bt, C, S), lambda n: (n, 0, 0)),  # g, Bt batches/step
        ],
        out_specs=(
            pl.BlockSpec((Bt, 1, S), lambda n: (n, 0, 0)),  # logits (lane-dense S)
            pl.BlockSpec((Bt, 1, C), lambda n: (n, 0, 0)),  # pooled features
        ),
        compiler_params=pltpu.CompilerParams(
            dimension_semantics=("parallel",),
            vmem_limit_bytes=32 * 1024 * 1024,  # raise v5e's 16 MiB default
        ),
    )(w2, l3, g3)

    c_out = c_out[:N].reshape(N, 1, W, H)
    g_out = g_out[:N].reshape(N, C)
    return c_out, g_out


def _reference(l, g, weight, normalize_attn=True):
    """Pure-JAX reference mirroring the PyTorch forward."""
    N, C, W, H = l.shape
    x = l + g
    c = jnp.einsum('oc,ncwh->nowh', weight, x)              # (N, 1, W, H)
    if normalize_attn:
        a = jax.nn.softmax(c.reshape(N, 1, -1), axis=2).reshape(N, 1, W, H)
        gout = (a * l).reshape(N, C, -1).sum(axis=2)
    else:
        a = jax.nn.sigmoid(c)
        gout = (a * l).mean(axis=(2, 3))
    return c, gout


if __name__ == "__main__":
    N, C, W, H = 2, 4, 16, 16

    key = jax.random.PRNGKey(0)
    k_l, k_g, k_w = jax.random.split(key, 3)
    l = jax.random.normal(k_l, (N, C, W, H), dtype=jnp.float32)
    g = jax.random.normal(k_g, (N, C, W, H), dtype=jnp.float32)
    # Deterministic conv1x1 weight (out_channels=1, in_channels=C), no bias.
    weight = jax.random.normal(k_w, (1, C), dtype=jnp.float32) * (1.0 / C ** 0.5)

    for normalize in (True, False):
        c_out, g_out = linear_attention_block(l, g, weight, normalize_attn=normalize)
        jax.block_until_ready((c_out, g_out))

        c_ref, g_ref = _reference(l, g, weight, normalize_attn=normalize)
        assert c_out.shape == (N, 1, W, H) and g_out.shape == (N, C)
        assert jnp.allclose(c_out, c_ref, atol=1e-5, rtol=1e-5)
        # Normalization is now applied exactly on the pooled result -> tight tol.
        assert jnp.allclose(g_out, g_ref, atol=1e-4, rtol=1e-4)

    print("KERNEL_OK")
</pallas_src>

<mosaic_0001>
module attributes {stable_mosaic.version = 11 : i64} {
  func.func @_attn_kernel(%arg0: i32, %arg1: memref<4x1xf32, #tpu.memory_space<vmem>>, %arg2: memref<1x4x256xf32, #tpu.memory_space<vmem>>, %arg3: memref<1x4x256xf32, #tpu.memory_space<vmem>>, %arg4: memref<1x1x256xf32, #tpu.memory_space<vmem>>, %arg5: memref<1x1x4xf32, #tpu.memory_space<vmem>>) attributes {dimension_semantics = [#tpu.dimension_semantics<parallel>], iteration_bounds = array<i64: 2>, scalar_prefetch = 0 : i64, scratch_operands = 0 : i64, tpu.core_type = #tpu.core_type<tc>, window_params = [{pipeline_mode = #tpu.pipeline_mode<synchronous>, transform_indices = @transform_0, window_bounds = array<i64: 4, 1>}, {transform_indices = @transform_1, window_bounds = array<i64: 1, 4, 256>}, {transform_indices = @transform_2, window_bounds = array<i64: 1, 4, 256>}, {transform_indices = @transform_3, window_bounds = array<i64: 1, 1, 256>}, {transform_indices = @transform_4, window_bounds = array<i64: 1, 1, 4>}]} {
    %c0 = arith.constant 0 : index
    %c0_0 = arith.constant 0 : index
    %c0_1 = arith.constant 0 : index
    %0 = vector.load %arg2[%c0, %c0_0, %c0_1] : memref<1x4x256xf32, #tpu.memory_space<vmem>>, vector<1x4x256xf32>
    %c0_2 = arith.constant 0 : index
    %c0_3 = arith.constant 0 : index
    %c0_4 = arith.constant 0 : index
    %1 = vector.load %arg3[%c0_2, %c0_3, %c0_4] : memref<1x4x256xf32, #tpu.memory_space<vmem>>, vector<1x4x256xf32>
    %c0_5 = arith.constant 0 : index
    %c0_6 = arith.constant 0 : index
    %2 = vector.load %arg1[%c0_5, %c0_6] : memref<4x1xf32, #tpu.memory_space<vmem>>, vector<4x1xf32>
    %3 = arith.addf %0, %1 : vector<1x4x256xf32>
    %4 = vector.shape_cast %2 : vector<4x1xf32> to vector<1x4x1xf32>
    %5 = vector.broadcast %4 : vector<1x4x1xf32> to vector<1x4x256xf32>
    %6 = arith.mulf %3, %5 : vector<1x4x256xf32>
    %cst = arith.constant dense<0.000000e+00> : vector<1x256xf32>
    %7 = vector.multi_reduction <add>, %6, %cst [1] : vector<1x4x256xf32> to vector<1x256xf32>
    %8 = vector.shape_cast %7 : vector<1x256xf32> to vector<1x1x256xf32>
    %c0_7 = arith.constant 0 : index
    %c0_8 = arith.constant 0 : index
    %c0_9 = arith.constant 0 : index
    %9 = vector.load %arg4[%c0_7, %c0_8, %c0_9] : memref<1x1x256xf32, #tpu.memory_space<vmem>>, vector<1x1x256xf32>
    tpu.vector_store %arg4[%c0_7, %c0_8, %c0_9], %8 {strides = array<i32>} : memref<1x1x256xf32, #tpu.memory_space<vmem>>, vector<1x1x256xf32>,
    %cst_10 = arith.constant dense<0xFF800000> : vector<1x1xf32>
    %10 = vector.multi_reduction <maximumf>, %8, %cst_10 [2] : vector<1x1x256xf32> to vector<1x1xf32>
    %11 = vector.shape_cast %10 : vector<1x1xf32> to vector<1x1x1xf32>
    %12 = vector.broadcast %11 : vector<1x1x1xf32> to vector<1x1x256xf32>
    %13 = arith.subf %8, %12 : vector<1x1x256xf32>
    %14 = math.exp %13 : vector<1x1x256xf32>
    %cst_11 = arith.constant dense<0.000000e+00> : vector<1x1xf32>
    %15 = vector.multi_reduction <add>, %14, %cst_11 [2] : vector<1x1x256xf32> to vector<1x1xf32>
    %16 = vector.shape_cast %15 : vector<1x1xf32> to vector<1x1x1xf32>
    "tpu.trace_start"() <{level = 10 : i32, message = "bks,bcs->bkc"}> : () -> ()
    %cst_12 = arith.constant dense<0.000000e+00> : vector<1x1x4xf32>
    %17 = tpu.matmul %14, %0, %cst_12 {dimension_numbers = #tpu.dot_dimension_numbers<[2], [2], [1], [1], [0, 0, 0, 1, 1, 1], [0], [0]>} : vector<1x1x256xf32>, vector<1x4x256xf32>, vector<1x1x4xf32> -> vector<1x1x4xf32>
    "tpu.trace_stop"() : () -> ()
    %18 = vector.broadcast %16 : vector<1x1x1xf32> to vector<1x1x4xf32>
    %19 = arith.divf %17, %18 : vector<1x1x4xf32>
    %c0_13 = arith.constant 0 : index
    %c0_14 = arith.constant 0 : index
    %c0_15 = arith.constant 0 : index
    %20 = vector.load %arg5[%c0_13, %c0_14, %c0_15] : memref<1x1x4xf32, #tpu.memory_space<vmem>>, vector<1x1x4xf32>
    tpu.vector_store %arg5[%c0_13, %c0_14, %c0_15], %19 {strides = array<i32>} : memref<1x1x4xf32, #tpu.memory_space<vmem>>, vector<1x1x4xf32>,
    return
  }
  func.func @transform_0(%arg0: i32) -> (i32, i32) {
    %c0_i32 = arith.constant 0 : i32
    %c0_i32_0 = arith.constant 0 : i32
    %c0_i32_1 = arith.constant 0 : i32
    return %c0_i32, %c0_i32_0 : i32, i32
  }
  func.func @transform_1(%arg0: i32) -> (i32, i32, i32) {
    %c0_i32 = arith.constant 0 : i32
    %c0_i32_0 = arith.constant 0 : i32
    %c0_i32_1 = arith.constant 0 : i32
    return %arg0, %c0_i32, %c0_i32_0 : i32, i32, i32
  }
  func.func @transform_2(%arg0: i32) -> (i32, i32, i32) {
    %c0_i32 = arith.constant 0 : i32
    %c0_i32_0 = arith.constant 0 : i32
    %c0_i32_1 = arith.constant 0 : i32
    return %arg0, %c0_i32, %c0_i32_0 : i32, i32, i32
  }
  func.func @transform_3(%arg0: i32) -> (i32, i32, i32) {
    %c0_i32 = arith.constant 0 : i32
    %c0_i32_0 = arith.constant 0 : i32
    %c0_i32_1 = arith.constant 0 : i32
    return %arg0, %c0_i32, %c0_i32_0 : i32, i32, i32
  }
  func.func @transform_4(%arg0: i32) -> (i32, i32, i32) {
    %c0_i32 = arith.constant 0 : i32
    %c0_i32_0 = arith.constant 0 : i32
    %c0_i32_1 = arith.constant 0 : i32
    return %arg0, %c0_i32, %c0_i32_0 : i32, i32, i32
  }
}

</mosaic_0001>

<bundles_post_ra>
// kernel: tpu_custom_call.1
= control target key start
LH: loop header
LB: loop body
LE: loop exit
PB: predicated region body
PF: predicated region fallthrough
CT: control target
= control target key end

     0   :  { %10 = vsyncpa [#allocation3], 0  ;;  %s1061_s0 = inlined_call_operand.vmem [shape: f32[4,1], index: 0, kind: input, shape index: {}]   ;;  %s1062_s1 = inlined_call_operand.hbm [shape: f32[2,4,256], index: 1, kind: input, shape index: {}]   ;;  %s1063_s2 = inlined_call_operand.hbm [shape: f32[2,4,256], index: 2, kind: input, shape index: {}]   ;;  %s1064_s3 = inlined_call_operand.hbm [shape: f32[2,1,256], index: 3, kind: output, shape index: {0}]   ;;  %s1065_s4 = inlined_call_operand.hbm [shape: f32[2,1,4], index: 4, kind: output, shape index: {1}]  }
   0x1   :  { %12 = vsyncpa [#allocation3 + $0x1], 0 }
   0x2   :  { %13 = vsyncpa [#allocation6], 0 }
   0x3   :  { %15 = vsyncpa [#allocation6 + $0x1], 0 }
   0x4   :  { %16 = vsyncpa [#allocation4], 0 }
   0x5   :  { %18 = vsyncpa [#allocation4 + $0x1], 0 }
   0x6   :  { %19 = vsyncpa [#allocation9], 0 }
   0x7   :  { %21 = vsyncpa [#allocation9 + $0x1], 0  ;;  %s839_s15 = smov 0   ;;  %s841_s16 = smov 0  }
   0x8   :  { %s843_s17 = smov 0   ;;  %s845_s18 = smov 0  }
   0x9 LB: > { %s860_s19 = sadd.s32 4294967295, %s805_s18   ;;  %s562_s20 = sadd.s32 4294967294, %s805_s18   ;;  %s805_s18 = sphi %s845_s18, %s1084_s18   ;;  %s801_s17 = sphi %s843_s17, %s1083_s17   ;;  %s797_s16 = sphi %s841_s16, %s1082_s16   ;;  %s793_s15 = sphi %s839_s15, %s1081_s15  }
   0xa   : > { %s864_s21 = sadd.s32 1, %s805_s18   ;;  %s55_s22 = sadd.s32 1, %s801_s17 }
   0xb   : > { %s52_s23 = ssub.s32 %s805_s18, %s864_s21  ;;  %p62_p0 = scmp.ne.s32.totalorder %s801_s17, %s797_s16 }
   0xc   : > { %p53_p1 = scmp.eq.s32.totalorder %s52_s23, 0  ;;  %p63_p2 = scmp.eq.s32.totalorder %s805_s18, 0 }
   0xd   : > { %p68_p3 = scmp.ne.s32.totalorder %s797_s16, %s793_s15  ;;  %p69_p4 = scmp.eq.s32.totalorder %s860_s19, 0 }
   0xe   : > { %s876_s24 = scalar_select %p53_p1, %s801_s17, %s55_s22  }
   0xf   : > { %p878_p5 = por %p63_p2, %p62_p0  ;;  %p882_p6 = por %p69_p4, %p68_p3 }
  0x10   : > { %p118_p7 = scmp.eq.s32.totalorder %s860_s19, 1  ;;  %p124_p8 = scmp.eq.s32.totalorder %s562_s20, 1 }
  0x11   : > { %s1069_s26 = scalar_select %p882_p6, 1, 0 }
  0x12   : > { %p606_p10 = scmp.lt.s32.totalorder %s805_s18, 2  ;;  %p889_p11 = por %p118_p7, %p62_p0 }
  0x13   : > { %p893_p12 = por %p124_p8, %p68_p3  ;;  %s898_s29 = sand.u32 1, %s801_s17  }
  0x14   : > { %s1070_s27 = scalar_select %p889_p11, 1, 0 }
  0x15   : > { %s1071_s28 = scalar_select %p893_p12, 1, 0 }
  0x16   : > { %s581_s30 = sshll.u32 %s805_s18, 7  ;;  %s565_s5 = sshll.u32 %s898_s29, 3 }
  0x17   : > { %s907_s8 = scalar_lea.hbm %s1062_s1, %s581_s30  ;;  %s177_s9 = scalar_lea.vmem [#allocation2], %s565_s5 }
  0x18   : > { %s185_s10 = sshll.u32 %s177_s9, 4  ;;  %p913_p13 = pnand %p606_p10, %p878_p5  ;;  %s917_s10 = int_to_ptr.vmem [resolvable:$true] %s185_s10 }
  0x19   : > { %s174_s12 = scalar_lea.sflag [#allocation3], %s898_s29  ;;  %s651_s13 = scalar_lea.hbm %s907_s8, 128 }
  0x1a   : > { %p652_p2 = scmp.ne.s32.totalorder %s907_s8, %s651_s13  ;;  %p653_p3 = pneg %p913_p13 }
  0x1b   : > { %s656_s22 = scalar_lea.hbm %s1062_s1, 256  ;;  %p657_p5 = scmp.lt.s32.totalorder %s907_s8, %s1062_s1 }
  0x1c   : > { %p654_p4 = pnand %p653_p3, %p652_p2  ;;  %p658_p8 = scmp.lt.s32.totalorder %s656_s22, %s651_s13 }
  0x1e   : > { %p655_p7 = pneg %p654_p4  ;;  %p659_p10 = por %p658_p8, %p657_p5 }
  0x20   : > { %p660_p9 = pnand %p659_p10, %p655_p7 }
  0x22   : > { %663 = shalt.err (!%p660_p9)
}
  0x23   : > { %s664_s6 = scalar_lea.vmem %s917_s10, 128  ;;  %s807_s7 = smov [#allocation2]  }
  0x24   : > { %p665_p0 = scmp.ne.s32.totalorder %s917_s10, %s664_s6  ;;  %s669_s9 = sshll.u32 %s807_s7, 4  ;;  %s670_s9 = int_to_ptr.vmem [resolvable:$false] %s669_s9 }
  0x25   : > { %s671_s14 = scalar_lea.vmem %s670_s9, 256  ;;  %p672_p1 = scmp.lt.s32.totalorder %s917_s10, %s670_s9 }
  0x26   : > { %p667_p2 = pnand %p665_p0, %p653_p3  ;;  %p673_p12 = scmp.lt.s32.totalorder %s671_s14, %s664_s6 }
  0x28   : > { %p668_p4 = pneg %p667_p2  ;;  %p674_p11 = por %p673_p12, %p672_p1 }
  0x2a   : > { %p675_p5 = pnand %p674_p11, %p668_p4 }
  0x2c   : > { %678 = shalt.err (!%p675_p5)
}
  0x2d   : > { %595 = dma.hbm_to_vmem [thread:$0]  (!%p913_p13), %s907_s8, 128, %s917_s10, %s174_s12  }
  0x2e   : > { %p1073_p9 = scmp.lt.s32.totalorder %s805_s18, 3  ;;  %p1074_p0 = scmp.ge.s32.totalorder %s805_s18, 1 }
  0x2f   : > { %s959_s23 = scalar_lea.hbm %s1063_s2, %s581_s30  ;;  %s196_s25 = scalar_lea.vmem [#allocation5], %s565_s5 }
  0x30   : > { %p950_p7 = pnand %p1074_p0, %p1073_p9  ;;  %s204_s6 = sshll.u32 %s196_s25, 4  ;;  %s205_s6 = int_to_ptr.vmem [resolvable:$true] %s204_s6 }
  0x31   : > { %s193_s8 = scalar_lea.sflag [#allocation6], %s898_s29  ;;  %s679_s10 = scalar_lea.hbm %s959_s23, 128 }
  0x32   : > { %s1075_s13 = scalar_select %p950_p7, 1, 0 }
  0x33   : > { %p680_p11 = scmp.ne.s32.totalorder %s959_s23, %s679_s10  ;;  %s684_s9 = scalar_lea.hbm %s1063_s2, 256 }
  0x34   : > { %p685_p8 = scmp.lt.s32.totalorder %s959_s23, %s1063_s2  ;;  %p686_p10 = scmp.lt.s32.totalorder %s684_s9, %s679_s10 }
  0x35   : > { %p682_p12 = pnand %p680_p11, %p653_p3 }
  0x36   : > { %p687_p2 = por %p686_p10, %p685_p8 }
  0x37   : > { %p683_p1 = pneg %p682_p12 }
  0x39   : > { %p688_p4 = pnand %p687_p2, %p683_p1 }
  0x3b   : > { %691 = shalt.err (!%p688_p4)
}
  0x3c   : > { %s692_s5 = scalar_lea.vmem %s205_s6, 128  ;;  %s808_s29 = smov [#allocation5]  }
  0x3d   : > { %p693_p5 = scmp.ne.s32.totalorder %s205_s6, %s692_s5  ;;  %s697_s20 = sshll.u32 %s808_s29, 4  ;;  %s698_s20 = int_to_ptr.vmem [resolvable:$false] %s697_s20 }
  0x3e   : > { %s699_s22 = scalar_lea.vmem %s698_s20, 256  ;;  %p700_p11 = scmp.lt.s32.totalorder %s205_s6, %s698_s20 }
  0x3f   : > { %p695_p9 = pnand %p693_p5, %p653_p3  ;;  %p701_p12 = scmp.lt.s32.totalorder %s699_s22, %s692_s5 }
  0x41   : > { %p696_p0 = pneg %p695_p9  ;;  %p702_p6 = por %p701_p12, %p700_p11 }
  0x43   : > { %p703_p7 = pnand %p702_p6, %p696_p0 }
  0x45   : > { %706 = shalt.err (!%p703_p7)
}
  0x46   : > { %598 = dma.hbm_to_vmem [thread:$0]  (!%p913_p13), %s959_s23, 128, %s205_s6, %s193_s8  }
  0x47   : > { %p1076_p1 = scmp.ne.s32.totalorder %s1075_s13, 0 }
  0x48   : > { %s985_s25 = sand.u32 (!%p1076_p1), 1, %s797_s16   ;;  %p1077_p3 = scmp.ne.s32.totalorder (!%p1076_p1), %s1069_s26, 0 }
  0x49   : > { %213 = sbr.rel (%p1076_p1) target bundleno = 594 (0x252), region = 32  ;;  %s572_s10 = sshll.u32 (!%p1076_p1), %s985_s25, 3 }
  0x4a   : > { %s216_s12 = scalar_lea.sflag (!%p1076_p1), [#allocation3], %s985_s25  ;;  %s219_s7 = scalar_lea.vmem (!%p1076_p1), [#allocation2], %s572_s10 }
  0x4e   : > { %776 = dma.done.wait (%p1077_p3), %s216_s12, 128  }
  0x4f   : > { %778 = vsyncadd (%p1077_p3), %s216_s12, 4294967168  ;;  %s225_s11 = scalar_lea.sflag [#allocation6], %s985_s25  ;;  %s228_s23 = scalar_lea.vmem [#allocation5], %s572_s10 }
  0x50   : > { %780 = dma.done.wait (%p1077_p3), %s225_s11, 128  }
  0x51   : > { %782 = vsyncadd (%p1077_p3), %s225_s11, 4294967168  ;;  %v809_v0 = vmov 0   ;;  %v264_v1 = vld [vmem:[%s1061_s0] sm:$0xf]  ;;  %v810_v2 = vmov 839922192   ;;  %v273_v4 = vlaneseq }
  0x52   : > { %643 = vset.pattern.permute.xlu0 %v809_v0  ;;  %v271_v3 = vunpack.c.l.s4 %v810_v2  ;;  %v262_v7 = vld [vmem:[%s219_s7] sm:$0xff]  ;;  %v263_v8 = vld [vmem:[%s228_s23] sm:$0xff]  ;;  %vm282_vm0 = vcmask 1043456   ;;  %v811_v20 = vmov 1966171168   ;;  %s574_s26 = sshll.u32 %s985_s25, 1 }
  0x53   : > { %268 = vperm.xlu0 %643, %v264_v1   ;;  %v274_v6 = vshrl.u32 %v273_v4, 7  ;;  %v265_v10 = vadd.f32 %v263_v8, %v262_v7  ;;  %v301_v21 = vunpack.c.l.s4 %v811_v20  ;;  %vm317_vm1 = vcmp.lt.s32.totalorder %v273_v4, 256  ;;  %s255_s8 = scalar_lea.vmem [#allocation7], %s574_s26  ;;  %s583_s9 = sshll.u32 %s860_s19, 5 }
  0x54   : > { %v272_v5 = vunpack.c.0.s8 %v271_v3  ;;  %v333_v37 = vcombine.high %v262_v7, %v262_v7  ;;  %s426_s5 = scalar_lea.hbm %s1064_s3, %s583_s9  ;;  %s428_s29 = sshll.u32 %s255_s8, 4  ;;  %s429_s29 = int_to_ptr.vmem [resolvable:$true] %s428_s29 }
  0x55   : > { %v302_v26 = vunpack.c.0.s8 %v301_v21  ;;  %s410_s20 = scalar_lea.sflag [#allocation4], %s985_s25  ;;  %s707_s22 = scalar_lea.vmem %s429_s29, 32 }
  0x56   : > { %v275_v9 = vsub.s32 %v272_v5, %v274_v6  ;;  %365 = vmatprep.subr.mxu0 %v333_v37  ;;  %p708_p6 = scmp.ne.s32.totalorder %s429_s29, %s707_s22  ;;  %p1078_p13 = scmp.ne.s32.totalorder %s1070_s27, 0 }
  0x57   : > { %v305_v30 = vsub.s32 %v302_v26, %v274_v6  ;;  %366 = vmatpush1.xpose.msra.mxu0 %v262_v7  ;;  %s812_s10 = smov [#allocation7]  }
  0x58   : > { %p709_p7 = pnand %p708_p6, %p1078_p13  ;;  %s711_s12 = sshll.u32 %s812_s10, 4  ;;  %s712_s12 = int_to_ptr.vmem [resolvable:$false] %s711_s12 }
  0x59   : > { %s713_s7 = scalar_lea.vmem %s712_s12, 64  ;;  %p714_p10 = scmp.lt.s32.totalorder %s429_s29, %s712_s12 }
  0x5a   : > { %p710_p8 = pneg %p709_p7  ;;  %p715_p2 = scmp.lt.s32.totalorder %s713_s7, %s707_s22 }
  0x5c   : > { %p716_p4 = por %p715_p2, %p714_p10 }
  0x5e   : > { %p717_p5 = pnand %p716_p4, %p710_p8 }
  0xce   : > { %v269_v11 = vpop.permute.xlu0 %268 }
  0xcf   : > { %v276_v12 = vrot.slane %v269_v11, %v275_v9 }
  0xd1   : > { %v278_v13 = vmul.f32 %v276_v12, %v265_v10 }
  0xd3   : > { %v280_v14 = vcombine.high %v278_v13, %v278_v13  ;;  %v283_v15 = vsel %vm282_vm0, %v278_v13, 0.0 }
  0xd4   : > { %v284_v16 = vrot.slane %v283_v15, 4 }
  0xd5   : > { %v290_v17 = vsel %vm282_vm0, %v280_v14, 0.0 }
  0xd6   : > { %v285_v18 = vadd.f32 %v284_v16, %v283_v15  ;;  %v291_v19 = vrot.slane %v290_v17, 4 }
  0xd8   : > { %v286_v22 = vrot.slane %v285_v18, 2  ;;  %v292_v23 = vadd.f32 %v291_v19, %v290_v17 }
  0xda   : > { %v287_v24 = vadd.f32 %v286_v22, %v285_v18  ;;  %v293_v25 = vrot.slane %v292_v23, 2 }
  0xdc   : > { %v288_v27 = vrot.slane %v287_v24, 1  ;;  %v294_v28 = vadd.f32 %v293_v25, %v292_v23 }
  0xde   : > { %v295_v29 = vrot.slane %v294_v28, 1  ;;  %v289_v31 = vadd.f32 %v288_v27, %v287_v24 }
  0xe0   : > { %v296_v32 = vadd.f32 %v295_v29, %v294_v28 }
  0xe2   : > { %v320_v33 = vmax.f32 %v289_v31, %v296_v32  ;;  %v299_v34 = vcombine.low %v289_v31, %v296_v32 }
  0xe4   : > { %321 = vmax.xlane.f32.xlu0 %v320_v33  ;;  %v306_v35 = vrot.slane %v299_v34, %v305_v30 }
  0xe6   : > { %v313_v36 = vrot.slane %v306_v35, %v305_v30 }
  0xe8   : > { %319 = vst.msk [vmem:[%s255_s8] sm:$0x3] %vm317_vm1, %v313_v36 }
 0x16d   : > { %v322_v38 = vpop.xlane.xlu0 %321 }
 0x16e   : > { %v323_v39 = vsub.f32 %v289_v31, %v322_v38  ;;  %v324_v40 = vsub.f32 %v296_v32, %v322_v38 }
 0x170   : > { %v325_v41 = vmul.f32 1.442695, %v323_v39  ;;  %v327_v42 = vmul.f32 1.442695, %v324_v40 }
 0x172   : > { %645 = vpow2.f32 %v325_v41 }
 0x173   : > { %647 = vpow2.f32 %v327_v42 }
 0x17f   : > { %v646_v43 = vpop.eup %645 }
 0x180   : > { %v648_v44 = vpop.eup %647 }
 0x181   : > { %399 = vmatprep.mubr.f32.mxu0 %v648_v44  ;;  %v329_v45 = vadd.f32 %v648_v44, %v646_v43 }
 0x182   : > { %400 = vmatmul.mubr.f32.vlgmr.msra.gmra.mxu0 %v646_v43 }
 0x183   : > { %330 = vadd.xlane.f32.xlu1 %v329_v45 }
 0x184   : > { %720 = shalt.err (!%p717_p5)
}
 0x185   : > { %s721_s11 = scalar_lea.hbm %s426_s5, 32  ;;  %s725_s6 = scalar_lea.hbm %s1064_s3, 64 }
 0x186   : > { %p722_p9 = scmp.ne.s32.totalorder %s426_s5, %s721_s11  ;;  %p726_p12 = scmp.lt.s32.totalorder %s426_s5, %s1064_s3 }
 0x187   : > { %p727_p1 = scmp.lt.s32.totalorder %s725_s6, %s721_s11 }
 0x188   : > { %p723_p0 = pnand %p722_p9, %p1078_p13 }
 0x189   : > { %p728_p3 = por %p727_p1, %p726_p12 }
 0x18a   : > { %p724_p11 = pneg %p723_p0 }
 0x18c   : > { %p729_p6 = pnand %p728_p3, %p724_p11 }
 0x18e   : > { %732 = shalt.err (!%p729_p6)
}
 0x18f   : > { %588 = dma.vmem_to_hbm [thread:$0]  (%p1078_p13), %s429_s29, 32, %s426_s5, %s410_s20   ;;  %vm407_vm2 = vcmask 24576  }
 0x190   : > { %s578_s9 = sshll.u32 %s860_s19, 4  ;;  %s261_s30 = scalar_lea.vmem [#allocation8], %s985_s25 }
 0x191   : > { %s441_s14 = sshll.u32 %s261_s30, 4  ;;  %s1024_s12 = scalar_lea.hbm %s1065_s4, %s578_s9  ;;  %s442_s14 = int_to_ptr.vmem [resolvable:$true] %s441_s14 }
 0x192   : > { %s415_s7 = scalar_lea.sflag [#allocation9], %s985_s25  ;;  %s733_s5 = scalar_lea.vmem %s442_s14, 16 }
 0x193   : > { %p734_p7 = scmp.ne.s32.totalorder %s442_s14, %s733_s5  ;;  %s813_s19 = smov [#allocation8]  }
 0x194   : > { %s737_s29 = sshll.u32 %s813_s19, 4  ;;  %s738_s29 = int_to_ptr.vmem [resolvable:$false] %s737_s29 }
 0x195   : > { %p735_p8 = pnand %p734_p7, %p1078_p13  ;;  %s739_s20 = scalar_lea.vmem %s738_s29, 32 }
 0x196   : > { %p740_p2 = scmp.lt.s32.totalorder %s442_s14, %s738_s29  ;;  %p741_p4 = scmp.lt.s32.totalorder %s739_s20, %s733_s5 }
 0x197   : > { %p736_p10 = pneg %p735_p8 }
 0x198   : > { %p742_p5 = por %p741_p4, %p740_p2 }
 0x19a   : > { %p743_p9 = pnand %p742_p5, %p736_p10 }
 0x20c   : > { %v331_v46 = vpop.xlane.xlu1 %330 }
 0x20d   : > { %649 = vrcp.f32 %v331_v46 }
 0x21a   : > { %v650_v47 = vpop.eup %649 }
 0x242   : > { %v401_v48 = vpop.f32.mrf.mxu0 }
 0x243   : > { %v406_v49 = vmul.f32 %v650_v47, %v401_v48 }
 0x244   : > { %v403_v50 = vpop.f32.mrf.mxu0 }
 0x245   : > { %408 = vst.msk [vmem:[%s261_s30] sm:$0x1] %vm407_vm2, %v406_v49 }
 0x246   : > { %746 = shalt.err (!%p743_p9)
}
 0x247   : > { %s747_s11 = scalar_lea.hbm %s1024_s12, 16  ;;  %s751_s13 = scalar_lea.hbm %s1065_s4, 32 }
 0x248   : > { %p748_p0 = scmp.ne.s32.totalorder %s1024_s12, %s747_s11  ;;  %p752_p1 = scmp.lt.s32.totalorder %s1024_s12, %s1065_s4 }
 0x249   : > { %p753_p3 = scmp.lt.s32.totalorder %s751_s13, %s747_s11 }
 0x24a   : > { %p749_p11 = pnand %p748_p0, %p1078_p13 }
 0x24b   : > { %p754_p6 = por %p753_p3, %p752_p1 }
 0x24c   : > { %p750_p12 = pneg %p749_p11 }
 0x24e   : > { %p755_p7 = pnand %p754_p6, %p750_p12 }
 0x250   : > { %758 = shalt.err (!%p755_p7)
}
 0x251   : > { %589 = dma.vmem_to_hbm [thread:$0]  (%p1078_p13), %s442_s14, 16, %s1024_s12, %s415_s7  }
 0x252 PF: > { %s453_s8 = sand.u32 1, %s793_s15   ;;  %p1079_p8 = scmp.ne.s32.totalorder %s1071_s28, 0 }
 0x253   : > { %p1080_p10 = scmp.ge.s32.totalorder %s805_s18, 2  ;;  %s454_s9 = scalar_lea.sflag [#allocation4], %s453_s8 }
 0x255   : > { %p600_p2 = pnand %p1080_p10, %p1079_p8 }
 0x257   : > { %p601_p4 = pneg %p600_p2 }
 0x259   : > { %784 = dma.done.wait (%p601_p4), %s454_s9, 32  }
 0x25a   : > { %786 = vsyncadd (%p601_p4), %s454_s9, 4294967264  ;;  %s463_s30 = scalar_lea.sflag [#allocation9], %s453_s8 }
 0x25b   : > { %788 = dma.done.wait (%p601_p4), %s463_s30, 16  }
 0x25c   : > { %790 = vsyncadd (%p601_p4), %s463_s30, 4294967280  ;;  %p24_p13 = scmp.ge.s32.totalorder %s864_s21, 4   ;;  %s1081_s15 = smov %s797_s16 }
 0x25d   : > { %s1082_s16 = smov %s801_s17  ;;  %s1083_s17 = smov %s876_s24 }
 0x25e   : > { %s1084_s18 = smov %s864_s21  ;;  %26 = sbr.rel (!%p24_p13) target bundleno = 9 (0x9), region = 107 }
 0x263   :  { %467 = vsyncpa [#allocation3], 1 }
 0x264   :  { %469 = vsyncpa [#allocation3 + $0x1], 1 }
 0x265   :  { %470 = vsyncpa [#allocation6], 1 }
 0x266   :  { %472 = vsyncpa [#allocation6 + $0x1], 1 }
 0x267   :  { %473 = vsyncpa [#allocation4], 1 }
 0x268   :  { %475 = vsyncpa [#allocation4 + $0x1], 1 }
 0x269   :  { %476 = vsyncpa [#allocation9], 1 }
 0x26a   :  { %478 = vsyncpa [#allocation9 + $0x1], 1 }

</bundles_post_ra>
